<compile_context>
chip_gen: v6e
topology: v6e:2x2x1
jax: 0.10.0
libtpu: 0.0.40
codegen_flags: <defaults>
</compile_context>

<pallas_src>
import functools

import jax
import jax.numpy as jnp
from jax.experimental import pallas as pl
from jax.experimental.pallas import tpu as pltpu


def _round_up(a: int, b: int) -> int:
    return (a + b - 1) // b * b


def _quantizer_kernel(x_ref, w_ref, w2h_ref, q_ref, idx_ref, sse_ref,
                      *, n_valid: int):
    """One tile of TN input rows against the full codebook.

    x_ref  : (TN, D)   input rows (native dtype)
    w_ref  : (K, D)    codebook (native dtype, VMEM-resident)
    w2h_ref: (K, 1)    f32 0.5*|w|^2
    q_ref  : (TN, D)   quantized rows (input dtype)
    idx_ref: (1, 1, TN) int32 nearest-codebook indices (lane-dense)
    sse_ref: (1, 1, 128) f32 partial sum of squared errors (scalar splat)
    """
    i = pl.program_id(0)
    x = x_ref[...]                                   # (TN, D)
    w = w_ref[...]                                   # (K, D)
    tn = x.shape[0]
    k = w.shape[0]

    # ---- distances (transposed layout, |x|^2 dropped, -2 folded) ----------
    # dist[k, n] = 0.5*|w_k|^2 - <x_n, w_k>   (argmin over k is unchanged)
    cdt = jnp.promote_types(x.dtype, w.dtype)
    xw = jax.lax.dot_general(
        w.astype(cdt), x.astype(cdt),
        dimension_numbers=(((1,), (1,)), ((), ())),   # contract lane dims
        preferred_element_type=jnp.float32)           # (K, TN)
    dist = w2h_ref[...] - xw                          # (K, TN)

    # ---- argmin over the codebook (first occurrence, like torch.argmin) ---
    dmin = jnp.min(dist, axis=0, keepdims=True)       # (1, TN)
    row = jax.lax.broadcasted_iota(jnp.int32, (k, tn), 0)
    idx = jnp.min(jnp.where(dist == dmin, row, k),
                  axis=0, keepdims=True)              # (1, TN) lane-dense
    idx_ref[...] = idx[None].astype(jnp.int32)        # (1, 1, TN)

    # ---- one-hot gather of the selected codebook rows ----------------------
    # One-hot LHS in the codebook's native dtype keeps the bf16 MXU path;
    # f32 accumulation makes each output element an exact w value.
    enc = (row == idx).astype(w.dtype)                # (K, TN)
    quant = jax.lax.dot_general(
        enc, w,
        dimension_numbers=(((0,), (0,)), ((), ())),   # enc^T @ w
        preferred_element_type=jnp.float32)           # (TN, D)
    q_ref[...] = quant.astype(q_ref.dtype)

    # ---- partial MSE numerator (mask rows beyond N) ------------------------
    xf = x.astype(jnp.float32)
    row_ids = i * tn + jax.lax.broadcasted_iota(jnp.int32, quant.shape, 0)
    diff = jnp.where(row_ids < n_valid, quant - xf, 0.0)
    sse = jnp.sum(diff * diff)
    sse_ref[...] = jnp.full(sse_ref.shape, sse, dtype=jnp.float32)


def ema_quantizer_forward(inputs, embedding_weight,
                          commitment_cost=0.25, ortho_loss_weight=0.09,
                          block_n=512):
    """Eval-mode forward of EMAQuantizer.

    Returns (quantized, loss, encoding_indices, inputs) like the nn.Module.
    """
    input_shape = inputs.shape
    k, d = embedding_weight.shape
    flat = inputs.reshape(-1, d)
    n = flat.shape[0]

    # Tile geometry: TN a multiple of the dtype sublane count, sized so the
    # grid has >= 2 steps when possible (keeps both v7x TensorCores busy).
    sub = 16 if flat.dtype == jnp.bfloat16 else 8
    tn = min(block_n, max(sub, _round_up(pl.cdiv(n, 2), sub)))
    num_tiles = pl.cdiv(n, tn)

    # Hoisted x-independent work: 0.5*|w|^2 (the -2 distance scale is folded
    # in), gram matrix + orthogonality loss are computed once in plain JAX.
    w_f32 = embedding_weight.astype(jnp.float32)
    w2_half = 0.5 * jnp.sum(w_f32 * w_f32, axis=1, keepdims=True)  # (K, 1)

    kernel = functools.partial(_quantizer_kernel, n_valid=n)

    quant_flat, idx_tiles, sse_tiles = pl.pallas_call(
        kernel,
        out_shape=(
            jax.ShapeDtypeStruct((n, d), inputs.dtype),             # quantized
            jax.ShapeDtypeStruct((num_tiles, 1, tn), jnp.int32),    # indices
            jax.ShapeDtypeStruct((num_tiles, 1, 128), jnp.float32), # part. SSE
        ),
        grid=(num_tiles,),
        in_specs=[
            pl.BlockSpec((tn, d), lambda i: (i, 0)),   # x tile (no D padding)
            pl.BlockSpec((k, d), lambda i: (0, 0)),    # codebook (resident)
            pl.BlockSpec((k, 1), lambda i: (0, 0)),    # 0.5*|w|^2 (resident)
        ],
        out_specs=(
            pl.BlockSpec((tn, d), lambda i: (i, 0)),
            pl.BlockSpec((1, 1, tn), lambda i: (i, 0, 0)),
            pl.BlockSpec((1, 1, 128), lambda i: (i, 0, 0)),
        ),
        compiler_params=pltpu.CompilerParams(
            dimension_semantics=("parallel",)),
    )(flat, embedding_weight, w2_half)

    indices = idx_tiles.reshape(-1)[:n].reshape(n, 1)

    # Loss assembly (cross-tile scalar reduction + x-independent ortho loss).
    mse = jnp.sum(sse_tiles[:, 0, 0]) / jnp.float32(n * d)   # == F.mse_loss
    gram = w_f32 @ w_f32.T
    off_diag = gram - jnp.diag(jnp.diag(gram))
    ortho = jnp.sqrt(jnp.sum(off_diag * off_diag))
    # q_latent_loss + commitment_cost * e_latent_loss + ortho_w * ortho
    loss = (1.0 + commitment_cost) * mse + ortho_loss_weight * ortho

    quantized = quant_flat.reshape(input_shape).astype(inputs.dtype)
    # Straight-through estimator: inputs + stop_grad(quantized - inputs)
    quantized = inputs + jax.lax.stop_gradient(quantized - inputs)
    return quantized, loss, indices, inputs


def _reference_forward(inputs, w, commitment_cost, ortho_loss_weight):
    """Pure-JAX reference (mirrors the PyTorch eval-mode math)."""
    flat = inputs.reshape(-1, w.shape[1])
    dist = (jnp.sum(flat ** 2, axis=1, keepdims=True)
            + jnp.sum(w ** 2, axis=1) - 2.0 * flat @ w.T)
    idx = jnp.argmin(dist, axis=1)
    enc = jax.nn.one_hot(idx, w.shape[0], dtype=jnp.float32)
    quant = (enc @ w).reshape(inputs.shape)
    mse = jnp.mean((quant - inputs) ** 2)
    gram = w @ w.T
    ortho = jnp.linalg.norm(gram - jnp.diag(jnp.diag(gram)))
    loss = (1.0 + commitment_cost) * mse + ortho_loss_weight * ortho
    return quant, loss, idx[:, None]


if __name__ == "__main__":
    num_embeddings = 64
    embedding_dim = 32
    batch = 16
    commitment_cost = 0.25
    ortho_loss_weight = 0.09

    key = jax.random.PRNGKey(0)
    k_in, k_emb = jax.random.split(key)

    inputs = jax.random.normal(k_in, (batch, embedding_dim), dtype=jnp.float32)
    # nn.Embedding weight ~ U(-1/K, 1/K), deterministic in-script init.
    embedding_weight = jax.random.uniform(
        k_emb, (num_embeddings, embedding_dim),
        minval=-1.0 / num_embeddings, maxval=1.0 / num_embeddings,
        dtype=jnp.float32)

    quantized, loss, indices, inputs_out = ema_quantizer_forward(
        inputs, embedding_weight, commitment_cost, ortho_loss_weight)
    jax.block_until_ready((quantized, loss, indices, inputs_out))

    # Sanity check against a pure-JAX reference.
    q_ref, loss_ref, idx_ref = _reference_forward(
        inputs, embedding_weight, commitment_cost, ortho_loss_weight)
    assert jnp.allclose(quantized, q_ref, atol=1e-5), "quantized mismatch"
    assert jnp.allclose(loss, loss_ref, atol=1e-5), "loss mismatch"
    assert jnp.array_equal(indices[:, 0], idx_ref[:, 0]), "indices mismatch"

    print("KERNEL_OK")
</pallas_src>

<mosaic_0001>
module attributes {stable_mosaic.version = 11 : i64} {
  func.func @_quantizer_kernel(%arg0: i32, %arg1: memref<8x32xf32, #tpu.memory_space<vmem>>, %arg2: memref<64x32xf32, #tpu.memory_space<vmem>>, %arg3: memref<64x1xf32, #tpu.memory_space<vmem>>, %arg4: memref<8x32xf32, #tpu.memory_space<vmem>>, %arg5: memref<1x1x8xi32, #tpu.memory_space<vmem>>, %arg6: memref<1x1x128xf32, #tpu.memory_space<vmem>>) attributes {dimension_semantics = [#tpu.dimension_semantics<parallel>], iteration_bounds = array<i64: 2>, scalar_prefetch = 0 : i64, scratch_operands = 0 : i64, tpu.core_type = #tpu.core_type<tc>, window_params = [{transform_indices = @transform_0, window_bounds = array<i64: 8, 32>}, {pipeline_mode = #tpu.pipeline_mode<synchronous>, transform_indices = @transform_1, window_bounds = array<i64: 64, 32>}, {pipeline_mode = #tpu.pipeline_mode<synchronous>, transform_indices = @transform_2, window_bounds = array<i64: 64, 1>}, {transform_indices = @transform_3, window_bounds = array<i64: 8, 32>}, {transform_indices = @transform_4, window_bounds = array<i64: 1, 1, 8>}, {transform_indices = @transform_5, window_bounds = array<i64: 1, 1, 128>}]} {
    %c0 = arith.constant 0 : index
    %c0_0 = arith.constant 0 : index
    %0 = vector.load %arg1[%c0, %c0_0] : memref<8x32xf32, #tpu.memory_space<vmem>>, vector<8x32xf32>
    %c0_1 = arith.constant 0 : index
    %c0_2 = arith.constant 0 : index
    %1 = vector.load %arg2[%c0_1, %c0_2] : memref<64x32xf32, #tpu.memory_space<vmem>>, vector<64x32xf32>
    %cst = arith.constant dense<0.000000e+00> : vector<64x8xf32>
    %2 = tpu.matmul %1, %0, %cst {dimension_numbers = #tpu.dot_dimension_numbers<[1], [1], [0], [0], [0, 0, 1, 0], [], []>} : vector<64x32xf32>, vector<8x32xf32>, vector<64x8xf32> -> vector<64x8xf32>
    %c0_3 = arith.constant 0 : index
    %c0_4 = arith.constant 0 : index
    %3 = vector.load %arg3[%c0_3, %c0_4] : memref<64x1xf32, #tpu.memory_space<vmem>>, vector<64x1xf32>
    %4 = vector.broadcast %3 : vector<64x1xf32> to vector<64x8xf32>
    %5 = arith.subf %4, %2 : vector<64x8xf32>
    %cst_5 = arith.constant dense<0x7F800000> : vector<8xf32>
    %6 = vector.multi_reduction <minimumf>, %5, %cst_5 [0] : vector<64x8xf32> to vector<8xf32>
    %7 = vector.shape_cast %6 : vector<8xf32> to vector<1x8xf32>
    %8 = tpu.iota {dimensions = array<i32: 0>} : vector<64x8xi32>
    %9 = vector.broadcast %7 : vector<1x8xf32> to vector<64x8xf32>
    %10 = arith.cmpf oeq, %5, %9 : vector<64x8xf32>
    %c64_i32 = arith.constant 64 : i32
    %11 = vector.broadcast %c64_i32 : i32 to vector<64x8xi32>
    %12 = arith.select %10, %8, %11 : vector<64x8xi1>, vector<64x8xi32>
    %cst_6 = arith.constant dense<2147483647> : vector<8xi32>
    %13 = vector.multi_reduction <minsi>, %12, %cst_6 [0] : vector<64x8xi32> to vector<8xi32>
    %14 = vector.shape_cast %13 : vector<8xi32> to vector<1x8xi32>
    %15 = vector.shape_cast %14 : vector<1x8xi32> to vector<1x1x8xi32>
    %c0_7 = arith.constant 0 : index
    %c0_8 = arith.constant 0 : index
    %c0_9 = arith.constant 0 : index
    %16 = vector.load %arg5[%c0_7, %c0_8, %c0_9] : memref<1x1x8xi32, #tpu.memory_space<vmem>>, vector<1x1x8xi32>
    tpu.vector_store %arg5[%c0_7, %c0_8, %c0_9], %15 {strides = array<i32>} : memref<1x1x8xi32, #tpu.memory_space<vmem>>, vector<1x1x8xi32>,
    %17 = vector.broadcast %14 : vector<1x8xi32> to vector<64x8xi32>
    %18 = arith.cmpi eq, %8, %17 : vector<64x8xi32>
    %19 = arith.extui %18 : vector<64x8xi1> to vector<64x8xi32>
    %20 = arith.sitofp %19 : vector<64x8xi32> to vector<64x8xf32>
    %cst_10 = arith.constant dense<0.000000e+00> : vector<8x32xf32>
    %21 = tpu.matmul %20, %1, %cst_10 {dimension_numbers = #tpu.dot_dimension_numbers<[0], [0], [1], [1], [0, 1, 1, 1], [], []>} : vector<64x8xf32>, vector<64x32xf32>, vector<8x32xf32> -> vector<8x32xf32>
    %c0_11 = arith.constant 0 : index
    %c0_12 = arith.constant 0 : index
    %22 = vector.load %arg4[%c0_11, %c0_12] : memref<8x32xf32, #tpu.memory_space<vmem>>, vector<8x32xf32>
    tpu.vector_store %arg4[%c0_11, %c0_12], %21 {strides = array<i32>} : memref<8x32xf32, #tpu.memory_space<vmem>>, vector<8x32xf32>,
    %c8_i32 = arith.constant 8 : i32
    %23 = arith.muli %arg0, %c8_i32 : i32
    %24 = tpu.iota {dimensions = array<i32: 0>} : vector<8x32xi32>
    %25 = vector.broadcast %23 : i32 to vector<8x32xi32>
    %26 = arith.addi %25, %24 : vector<8x32xi32>
    %c16_i32 = arith.constant 16 : i32
    %27 = vector.broadcast %c16_i32 : i32 to vector<8x32xi32>
    %28 = arith.cmpi slt, %26, %27 : vector<8x32xi32>
    %29 = arith.subf %21, %0 : vector<8x32xf32>
    %cst_13 = arith.constant 0.000000e+00 : f32
    %30 = vector.broadcast %cst_13 : f32 to vector<8x32xf32>
    %31 = arith.select %28, %29, %30 : vector<8x32xi1>, vector<8x32xf32>
    %32 = arith.mulf %31, %31 : vector<8x32xf32>
    %33 = vector.shape_cast %32 : vector<8x32xf32> to vector<1x8x32xf32>
    %cst_14 = arith.constant dense<0.000000e+00> : vector<1xf32>
    %34 = vector.multi_reduction <add>, %33, %cst_14 [1, 2] : vector<1x8x32xf32> to vector<1xf32>
    %35 = vector.shape_cast %34 : vector<1xf32> to vector<1x1x1xf32>
    %36 = vector.extract %35[0, 0, 0] : f32 from vector<1x1x1xf32>
    %37 = vector.broadcast %36 : f32 to vector<1x1x128xf32>
    %c0_15 = arith.constant 0 : index
    %c0_16 = arith.constant 0 : index
    %c0_17 = arith.constant 0 : index
    %38 = vector.load %arg6[%c0_15, %c0_16, %c0_17] : memref<1x1x128xf32, #tpu.memory_space<vmem>>, vector<1x1x128xf32>
    tpu.vector_store %arg6[%c0_15, %c0_16, %c0_17], %37 {strides = array<i32>} : memref<1x1x128xf32, #tpu.memory_space<vmem>>, vector<1x1x128xf32>,
    return
  }
  func.func @transform_0(%arg0: i32) -> (i32, i32) {
    %c0_i32 = arith.constant 0 : i32
    %c0_i32_0 = arith.constant 0 : i32
    return %arg0, %c0_i32 : i32, i32
  }
  func.func @transform_1(%arg0: i32) -> (i32, i32) {
    %c0_i32 = arith.constant 0 : i32
    %c0_i32_0 = arith.constant 0 : i32
    %c0_i32_1 = arith.constant 0 : i32
    return %c0_i32, %c0_i32_0 : i32, i32
  }
  func.func @transform_2(%arg0: i32) -> (i32, i32) {
    %c0_i32 = arith.constant 0 : i32
    %c0_i32_0 = arith.constant 0 : i32
    %c0_i32_1 = arith.constant 0 : i32
    return %c0_i32, %c0_i32_0 : i32, i32
  }
  func.func @transform_3(%arg0: i32) -> (i32, i32) {
    %c0_i32 = arith.constant 0 : i32
    %c0_i32_0 = arith.constant 0 : i32
    return %arg0, %c0_i32 : i32, i32
  }
  func.func @transform_4(%arg0: i32) -> (i32, i32, i32) {
    %c0_i32 = arith.constant 0 : i32
    %c0_i32_0 = arith.constant 0 : i32
    %c0_i32_1 = arith.constant 0 : i32
    return %arg0, %c0_i32, %c0_i32_0 : i32, i32, i32
  }
  func.func @transform_5(%arg0: i32) -> (i32, i32, i32) {
    %c0_i32 = arith.constant 0 : i32
    %c0_i32_0 = arith.constant 0 : i32
    %c0_i32_1 = arith.constant 0 : i32
    return %arg0, %c0_i32, %c0_i32_0 : i32, i32, i32
  }
}

</mosaic_0001>

<bundles_post_ra>
// kernel: tpu_custom_call.1
= control target key start
LH: loop header
LB: loop body
LE: loop exit
PB: predicated region body
PF: predicated region fallthrough
CT: control target
= control target key end

     0   :  { %11 = vsyncpa [#allocation3], 0  ;;  %s1406_s0 = inlined_call_operand.vmem [shape: f32[16,32], index: 0, kind: input, shape index: {}]   ;;  %s1407_s1 = inlined_call_operand.vmem [shape: f32[64,32], index: 1, kind: input, shape index: {}]   ;;  %s1408_s2 = inlined_call_operand.vmem [shape: f32[64,1], index: 2, kind: input, shape index: {}]   ;;  %s1409_s3 = inlined_call_operand.hbm [shape: f32[16,32], index: 3, kind: output, shape index: {0}]   ;;  %s1410_s4 = inlined_call_operand.hbm [shape: s32[2,1,8], index: 4, kind: output, shape index: {1}]   ;;  %s1411_s5 = inlined_call_operand.hbm [shape: f32[2,1,128], index: 5, kind: output, shape index: {2}]  }
   0x1   :  { %13 = vsyncpa [#allocation3 + $0x1], 0 }
   0x2   :  { %14 = vsyncpa [#allocation5], 0 }
   0x3   :  { %16 = vsyncpa [#allocation5 + $0x1], 0  ;;  %s1116_s18 = smov 0   ;;  %s1118_s19 = smov 0  }
   0x4   :  { %s1120_s20 = smov 0   ;;  %s1122_s21 = smov 0  }
   0x5 LB: > { %s1137_s22 = sadd.s32 4294967295, %s1078_s21   ;;  %s1412_s23 = sadd.s32 4294967294, %s1078_s21   ;;  %s1078_s21 = sphi %s1122_s21, %s1419_s21   ;;  %s1074_s20 = sphi %s1120_s20, %s1418_s20   ;;  %s1070_s19 = sphi %s1118_s19, %s1417_s19   ;;  %s1066_s18 = sphi %s1116_s18, %s1416_s18  }
   0x6   : > { %s1141_s24 = sadd.s32 1, %s1078_s21   ;;  %s97_s25 = sadd.s32 1, %s1074_s20 }
   0x7   : > { %s94_s26 = ssub.s32 %s1078_s21, %s1141_s24  ;;  %p107_p0 = scmp.ne.s32.totalorder %s1074_s20, %s1070_s19 }
   0x8   : > { %p95_p1 = scmp.eq.s32.totalorder %s94_s26, 0  ;;  %p108_p2 = scmp.eq.s32.totalorder %s1137_s22, 1 }
   0x9   : > { %p113_p3 = scmp.ne.s32.totalorder %s1070_s19, %s1066_s18  ;;  %p114_p4 = scmp.eq.s32.totalorder %s1412_s23, 1 }
   0xa   : > { %s1154_s27 = scalar_select %p95_p1, %s1074_s20, %s97_s25  }
   0xb   : > { %p1156_p5 = por %p108_p2, %p107_p0  ;;  %p1160_p6 = por %p114_p4, %p113_p3 }
   0xc   : > { %p827_p7 = scmp.ge.s32.totalorder %s1078_s21, 1  ;;  %p197_p8 = scmp.lt.s32.totalorder %s1078_s21, 3 }
   0xe   : > { %p198_p9 = pnand %p827_p7, %p197_p8 }
   0xf   : > { %p232_p10 = scmp.lt.s32.totalorder (!%p198_p9), %s1137_s22, 1  ;;  %s848_s14 = sshll.u32 (!%p198_p9), %s1137_s22, 3 }
  0x10   : > { %201 = sbr.rel (%p198_p9) target bundleno = 823 (0x337), region = 32  ;;  %s851_s25 = sshll.u32 (!%p198_p9), %s1137_s22, 4 }
  0x11   : > { %s1083_s10 = smov (!%p198_p9), [#allocation4]  }
  0x12   : > { %s966_s11 = sshll.u32 (!%p198_p9), %s1083_s10, 4  ;;  %s967_s11 = int_to_ptr.vmem [resolvable:$false] %s966_s11 }
  0x15   : > { %vm245_vm0 = vcmask 261120   ;;  %v237_v0 = vld [vmem:[%s1407_s1] sm:$0xff]  ;;  %v1080_v1 = vmov 0   ;;  %s233_s7 = scalar_select %p232_p10, %s1137_s22, 1  ;;  %v380_v2 = vld [vmem:[%s1408_s2 + $0x10] sm:$0xff]  ;;  %v381_v4 = vld [vmem:[%s1408_s2 + $0x18] sm:$0xff]  ;;  %v456_v60 = vlaneseq }
  0x16   : > { %875 = vmatprep.mubr.msk.f32.mxu0 %vm245_vm0, %v237_v0  ;;  %961 = vset.pattern.permute.xlu1 %v1080_v1  ;;  %v378_v3 = vld [vmem:[%s1408_s2] sm:$0xff]  ;;  %v379_v5 = vld [vmem:[%s1408_s2 + $0x8] sm:$0xff]  ;;  %v239_v9 = vld [vmem:[%s1407_s1 + $0x10] sm:$0xff]  ;;  %v1081_v18 = vmov 0.0   ;;  %vm1082_vm1 = vmmov 0   ;;  %vm434_vm2 = vcmask 64512  }
  0x17   : > { %960 = vset.pattern.permute.xlu0 %v1080_v1  ;;  %398 = vperm.xlu1 %961, %v380_v2   ;;  %s829_s12 = sshll.u32 %s233_s7, 3  ;;  %v238_v7 = vld [vmem:[%s1407_s1 + $0x8] sm:$0xff]  ;;  %v382_v10 = vld [vmem:[%s1408_s2 + $0x20] sm:$0xff]  ;;  %v240_v11 = vld [vmem:[%s1407_s1 + $0x18] sm:$0xff]  ;;  %v1250_v63 = vshrl.u32 %v456_v60, 7  ;;  %s697_s7 = scalar_lea.hbm %s1410_s4, %s851_s25 }
  0x18   : > { %388 = vperm.xlu0 %960, %v378_v3   ;;  %s235_s17 = scalar_lea.vmem %s1406_s0, %s829_s12  ;;  %v383_v8 = vld [vmem:[%s1408_s2 + $0x28] sm:$0xff]  ;;  %v385_v12 = vld [vmem:[%s1408_s2 + $0x38] sm:$0xff]  ;;  %v241_v13 = vld [vmem:[%s1407_s1 + $0x20] sm:$0xff]  ;;  %887 = vmatprep.subr.mxu1 %v1081_v18  ;;  %s1290_s12 = sand.u32 1, %s1070_s19  }
  0x19   : > { %v1187_v6 = vld [vmem:[%s235_s17] sm:$0xff]  ;;  %v384_v14 = vld [vmem:[%s1408_s2 + $0x30] sm:$0xff]  ;;  %v242_v15 = vld [vmem:[%s1407_s1 + $0x28] sm:$0xff]  ;;  %903 = vmatprep.mubr.msk.f32.mxu1 %vm1082_vm1, %v1081_v18  ;;  %v1253_v2 = vadd.s32 8, %v1250_v63  ;;  %v1256_v3 = vadd.s32 16, %v1250_v63  ;;  %s225_s13 = scalar_lea.vmem [#allocation4], %s1290_s12 }
  0x1a   : > { %873 = vmatprep.subr.msk.mxu0 %vm245_vm0, %v1187_v6  ;;  %v243_v16 = vld [vmem:[%s1407_s1 + $0x30] sm:$0xff]  ;;  %v244_v17 = vld [vmem:[%s1407_s1 + $0x38] sm:$0xff]  ;;  %s828_s15 = sshll.u32 %s1290_s12, 3  ;;  %s669_s17 = sand.u32 1, %s1137_s22  }
  0x1b   : > { %403 = vperm.xlu1 %961, %v381_v4   ;;  %874 = vmatpush3.xpose.msk.msra.mxu0 %vm245_vm0, %v1187_v6  ;;  %v1259_v4 = vadd.s32 24, %v1250_v63  ;;  %s1314_s16 = scalar_lea.vmem [#allocation2], %s828_s15  ;;  %s699_s26 = sshll.u32 %s225_s13, 4  ;;  %s700_s26 = int_to_ptr.vmem [resolvable:$true] %s699_s26 }
  0x1c   : > { %393 = vperm.xlu0 %960, %v379_v5   ;;  %888 = vmatpush3.msra.mxu1 %v244_v17  ;;  %v1262_v5 = vadd.s32 32, %v1250_v63  ;;  %s1329_s8 = scalar_lea.sflag [#allocation5], %s669_s17  ;;  %s962_s9 = scalar_lea.vmem %s700_s26, 16 }
  0x1d   : > { %889 = vmatprep.subr.mxu1 %v1081_v18  ;;  %p963_p11 = scmp.ne.s32.totalorder %s700_s26, %s962_s9  ;;  %p969_p0 = scmp.lt.s32.totalorder %s700_s26, %s967_s11 }
  0x1e   : > { %876 = vmatmul.mubr.msk.f32.vlgmr.msra.gmra.mxu0 %vm245_vm0, %v238_v7  ;;  %890 = vmatpush3.msra.mxu1 %v243_v16 }
  0x1f   : > { %413 = vperm.xlu1 %961, %v383_v8   ;;  %878 = vmatprep.mubr.msk.f32.mxu0 %vm245_vm0, %v239_v9  ;;  %v1268_v8 = vadd.s32 48, %v1250_v63  ;;  %p964_p12 = pnand %p963_p11, %p1156_p5 }
  0x20   : > { %408 = vperm.xlu0 %960, %v382_v10   ;;  %891 = vmatprep.subr.mxu1 %v1081_v18 }
  0x21   : > { %892 = vmatpush3.msra.mxu1 %v242_v15  ;;  %p965_p13 = pneg %p964_p12 }
  0x22   : > { %879 = vmatmul.mubr.msk.f32.gmra.mxu0 %vm245_vm0, %v240_v11  ;;  %893 = vmatprep.subr.mxu1 %v1081_v18 }
  0x23   : > { %423 = vperm.xlu1 %961, %v385_v12   ;;  %881 = vmatprep.mubr.msk.f32.mxu0 %vm245_vm0, %v241_v13 }
  0x24   : > { %418 = vperm.xlu0 %960, %v384_v14   ;;  %894 = vmatpush3.msra.mxu1 %v241_v13 }
  0x25   : > { %895 = vmatprep.subr.mxu1 %v1081_v18 }
  0x26   : > { %882 = vmatmul.mubr.msk.f32.gmra.mxu0 %vm245_vm0, %v242_v15  ;;  %896 = vmatpush3.msra.mxu1 %v240_v11 }
  0x27   : > { %884 = vmatprep.mubr.msk.f32.mxu0 %vm245_vm0, %v243_v16  ;;  %897 = vmatprep.subr.mxu1 %v1081_v18 }
  0x28   : > { %898 = vmatpush3.msra.mxu1 %v239_v9  ;;  %v1271_v9 = vadd.s32 56, %v1250_v63 }
  0x29   : > { %899 = vmatprep.subr.mxu1 %v1081_v18 }
  0x2a   : > { %885 = vmatmul.mubr.msk.f32.gmra.mxu0 %vm245_vm0, %v244_v17  ;;  %900 = vmatpush3.msra.mxu1 %v238_v7  ;;  %v1265_v7 = vadd.s32 40, %v1250_v63 }
  0x2b   : > { %901 = vmatprep.subr.mxu1 %v1081_v18 }
  0x2c   : > { %902 = vmatpush3.msra.mxu1 %v237_v0 }
  0x92   : > { %v399_v19 = vpop.permute.xlu1 %398 }
  0x93   : > { %v389_v20 = vpop.permute.xlu0 %388 }
  0x96   : > { %v404_v21 = vpop.permute.xlu1 %403 }
  0x97   : > { %v394_v23 = vpop.permute.xlu0 %393 }
  0x9a   : > { %v414_v26 = vpop.permute.xlu1 %413 }
  0x9b   : > { %v409_v28 = vpop.permute.xlu0 %408 }
  0x9e   : > { %v424_v35 = vpop.permute.xlu1 %423 }
  0x9f   : > { %v419_v41 = vpop.permute.xlu0 %418 }
  0xde   : > { %v877_v22 = vpop.f32.mrf.mxu0 }
  0xdf   : > { %v427_v34 = vsub.f32 %v394_v23, %v877_v22 }
  0xe0   : > { %v339_v24 = vpop.f32.mrf.mxu0 }
  0xe1   : > { %v426_v31 = vsub.f32 %v389_v20, %v339_v24  ;;  %v436_v48 = vsel %vm434_vm2, %v427_v34, inf }
  0xe2   : > { %v880_v25 = vpop.f32.mrf.mxu0 }
  0xe3   : > { %v429_v37 = vsub.f32 %v404_v21, %v880_v25  ;;  %v435_v43 = vsel %vm434_vm2, %v426_v31, inf }
  0xe4   : > { %v349_v27 = vpop.f32.mrf.mxu0 }
  0xe5   : > { %v428_v38 = vsub.f32 %v399_v19, %v349_v27  ;;  %v438_v49 = vsel %vm434_vm2, %v429_v37, inf }
  0xe6   : > { %v883_v29 = vpop.f32.mrf.mxu0 }
  0xe7   : > { %v431_v32 = vsub.f32 %v414_v26, %v883_v29  ;;  %v437_v50 = vsel %vm434_vm2, %v428_v38, inf }
  0xe8   : > { %v359_v30 = vpop.f32.mrf.mxu0 }
  0xe9   : > { %v430_v33 = vsub.f32 %v409_v28, %v359_v30  ;;  %v441_v44 = vsel %vm434_vm2, %v431_v32, inf }
  0xea   : > { %v886_v36 = vpop.f32.mrf.mxu0  ;;  %v442_v52 = vmin.f32 %v436_v48, %v441_v44 }
  0xeb   : > { %v439_v39 = vsel %vm434_vm2, %v430_v33, inf  ;;  %v433_v40 = vsub.f32 %v424_v35, %v886_v36 }
  0xec   : > { %v369_v42 = vpop.f32.mrf.mxu0  ;;  %v440_v47 = vmin.f32 %v435_v43, %v439_v39 }
  0xed   : > { %v445_v45 = vsel %vm434_vm2, %v433_v40, inf  ;;  %v432_v46 = vsub.f32 %v419_v41, %v369_v42 }
  0xee   : > { %v446_v53 = vmin.f32 %v438_v49, %v445_v45  ;;  %v447_v55 = vmin.f32 %v440_v47, %v442_v52  ;;  %v646_v49 = vstv %s848_s14  ;;  %s968_s14 = scalar_lea.vmem %s967_s11, 32 }
  0xef   : > { %v443_v51 = vsel %vm434_vm2, %v432_v46, inf  ;;  %p970_p1 = scmp.lt.s32.totalorder %s968_s14, %s962_s9 }
  0xf0   : > { %v444_v54 = vmin.f32 %v437_v50, %v443_v51  ;;  %v647_v50 = vadd.s32 %v646_v49, %v1250_v63 }
  0xf1   : > { %p971_p2 = por %p970_p1, %p969_p0 }
  0xf2   : > { %v448_v56 = vmin.f32 %v444_v54, %v446_v53 }
  0xf3   : > { %p972_p3 = pnand %p971_p2, %p965_p13 }
  0xf4   : > { %v449_v57 = vmin.f32 %v447_v55, %v448_v56 }
  0xf6   : > { %v450_v58 = vrot.slane %v449_v57, 4 }
  0xf8   : > { %v451_v59 = vmin.f32 %v449_v57, %v450_v58 }
  0xfa   : > { %v452_v61 = vrot.slane %v451_v59, 2 }
  0xfc   : > { %v453_v62 = vmin.f32 %v451_v59, %v452_v61 }
  0xfe   : > { %v454_v0 = vrot.slane %v453_v62, 1 }
 0x100   : > { %v455_v1 = vmin.f32 %v453_v62, %v454_v0 }
 0x102   : > { %vm465_vm3 = vcmp.eq.f32.partialorder %v426_v31, %v455_v1  ;;  %vm466_vm4 = vcmp.eq.f32.partialorder %v427_v34, %v455_v1  ;;  %vm467_vm5 = vcmp.eq.f32.partialorder %v428_v38, %v455_v1  ;;  %vm468_vm6 = vcmp.eq.f32.partialorder %v429_v37, %v455_v1 }
 0x103   : > { %vm469_vm7 = vcmp.eq.f32.partialorder %v430_v33, %v455_v1  ;;  %vm470_vm8 = vcmp.eq.f32.partialorder %v431_v32, %v455_v1  ;;  %vm471_vm9 = vcmp.eq.f32.partialorder %v432_v46, %v455_v1  ;;  %vm472_vm10 = vcmp.eq.f32.partialorder %v433_v40, %v455_v1 }
 0x104   : > { %v473_v10 = vsel %vm465_vm3, %v1250_v63, 64  ;;  %v474_v11 = vsel %vm466_vm4, %v1253_v2, 64  ;;  %v475_v12 = vsel %vm467_vm5, %v1256_v3, 64  ;;  %v476_v13 = vsel %vm468_vm6, %v1259_v4, 64 }
 0x105   : > { %v477_v14 = vsel %vm469_vm7, %v1262_v5, 64  ;;  %v478_v15 = vsel %vm470_vm8, %v1265_v7, 64  ;;  %v479_v16 = vsel %vm471_vm9, %v1268_v8, 64  ;;  %v480_v17 = vsel %vm472_vm10, %v1271_v9, 64 }
 0x106   : > { %v481_v19 = vsel %vm434_vm2, %v473_v10, 2147483647  ;;  %v482_v20 = vsel %vm434_vm2, %v474_v11, 2147483647  ;;  %v483_v21 = vsel %vm434_vm2, %v475_v12, 2147483647 }
 0x107   : > { %v484_v22 = vsel %vm434_vm2, %v476_v13, 2147483647  ;;  %v485_v23 = vsel %vm434_vm2, %v477_v14, 2147483647  ;;  %v488_v24 = vsel %vm434_vm2, %v478_v15, 2147483647 }
 0x108   : > { %vm486_vm11 = vcmp.lt.s32.totalorder %v481_v19, %v485_v23  ;;  %vm489_vm12 = vcmp.lt.s32.totalorder %v482_v20, %v488_v24  ;;  %v491_v25 = vsel %vm434_vm2, %v479_v16, 2147483647  ;;  %v494_v26 = vsel %vm434_vm2, %v480_v17, 2147483647 }
 0x109   : > { %v487_v27 = vsel %vm486_vm11, %v481_v19, %v485_v23  ;;  %v490_v28 = vsel %vm489_vm12, %v482_v20, %v488_v24  ;;  %vm492_vm13 = vcmp.lt.s32.totalorder %v483_v21, %v491_v25  ;;  %vm495_vm14 = vcmp.lt.s32.totalorder %v484_v22, %v494_v26 }
 0x10a   : > { %v493_v29 = vsel %vm492_vm13, %v483_v21, %v491_v25  ;;  %v496_v30 = vsel %vm495_vm14, %v484_v22, %v494_v26  ;;  %vm497_vm15 = vcmp.lt.s32.totalorder %v487_v27, %v490_v28  ;;  %vm512_vm2 = vcmask 57344  }
 0x10b   : > { %v498_v31 = vsel %vm497_vm15, %v487_v27, %v490_v28  ;;  %vm499_vm1 = vcmp.lt.s32.totalorder %v493_v29, %v496_v30  ;;  %vm570_vm15 = vcmask 523264  }
 0x10c   : > { %v500_v32 = vsel %vm499_vm1, %v493_v29, %v496_v30  ;;  %vm648_vm1 = vcmp.lt.s32.totalorder %v647_v50, 16 }
 0x10d   : > { %vm501_vm3 = vcmp.lt.s32.totalorder %v498_v31, %v500_v32 }
 0x10e   : > { %v502_v33 = vsel %vm501_vm3, %v498_v31, %v500_v32 }
 0x10f   : > { %v503_v34 = vrot.slane %v502_v33, 4 }
 0x111   : > { %vm504_vm4 = vcmp.lt.s32.totalorder %v502_v33, %v503_v34 }
 0x112   : > { %v505_v35 = vsel %vm504_vm4, %v502_v33, %v503_v34 }
 0x113   : > { %v506_v36 = vrot.slane %v505_v35, 2 }
 0x115   : > { %vm507_vm5 = vcmp.lt.s32.totalorder %v505_v35, %v506_v36 }
 0x116   : > { %v508_v37 = vsel %vm507_vm5, %v505_v35, %v506_v36 }
 0x117   : > { %v509_v38 = vrot.slane %v508_v37, 1 }
 0x119   : > { %vm510_vm6 = vcmp.lt.s32.totalorder %v508_v37, %v509_v38 }
 0x11a   : > { %v511_v39 = vsel %vm510_vm6, %v508_v37, %v509_v38 }
 0x11b   : > { %vm514_vm7 = vcmp.eq.s32.totalorder %v1250_v63, %v511_v39  ;;  %513 = vst.msk [vmem:[%s225_s13] sm:$0x1] %vm512_vm2, %v511_v39  ;;  %vm515_vm8 = vcmp.eq.s32.totalorder %v1253_v2, %v511_v39  ;;  %vm516_vm9 = vcmp.eq.s32.totalorder %v1256_v3, %v511_v39  ;;  %vm517_vm10 = vcmp.eq.s32.totalorder %v1259_v4, %v511_v39 }
 0x11c   : > { %v839_v40 = vsel %vm514_vm7, 1.0, %v1081_v18  ;;  %v840_v41 = vsel %vm515_vm8, 1.0, %v1081_v18  ;;  %v841_v42 = vsel %vm516_vm9, 1.0, %v1081_v18  ;;  %v842_v43 = vsel %vm517_vm10, 1.0, %v1081_v18 }
 0x11d   : > { %538 = vxpose.xlu0.b32.start [1/8] (short) (narrow) %v839_v40, 8  ;;  %vm518_vm11 = vcmp.eq.s32.totalorder %v1262_v5, %v511_v39  ;;  %vm519_vm12 = vcmp.eq.s32.totalorder %v1265_v7, %v511_v39  ;;  %vm520_vm13 = vcmp.eq.s32.totalorder %v1268_v8, %v511_v39  ;;  %vm521_vm14 = vcmp.eq.s32.totalorder %v1271_v9, %v511_v39 }
 0x11e   : > { %v843_v44 = vsel %vm518_vm11, 1.0, %v1081_v18  ;;  %v844_v45 = vsel %vm519_vm12, 1.0, %v1081_v18  ;;  %v845_v46 = vsel %vm520_vm13, 1.0, %v1081_v18  ;;  %v846_v47 = vsel %vm521_vm14, 1.0, %v1081_v18 }
 0x121   : > { %539 = vxpose.xlu0.b32.cont [2/8] (short) (narrow) %v840_v41, 8 }
 0x125   : > { %540 = vxpose.xlu0.b32.cont [3/8] (short) (narrow) %v841_v42, 8 }
 0x129   : > { %541 = vxpose.xlu0.b32.cont [4/8] (short) (narrow) %v842_v43, 8 }
 0x12d   : > { %542 = vxpose.xlu0.b32.cont [5/8] (short) (narrow) %v843_v44, 8 }
 0x131   : > { %543 = vxpose.xlu0.b32.cont [6/8] (short) (narrow) %v844_v45, 8 }
 0x135   : > { %544 = vxpose.xlu0.b32.cont [7/8] (short) (narrow) %v845_v46, 8 }
 0x139   : > { %545 = vxpose.xlu0.b32.end [8/8] (short) (narrow) %v846_v47, 8 }
 0x199   : > { %v554_v48 = vpop.trf.xlu0 }
 0x19a   : > { %904 = vmatmul.mubr.msk.f32.vlgmr.msra.gmra.mxu1 %vm570_vm15, %v554_v48 }
 0x25a   : > { %v640_v51 = vpop.f32.mrf.mxu1 }
 0x25b   : > { %644 = vst.msk [vmem:[%s1314_s16] sm:$0xff] %vm245_vm0, %v640_v51  ;;  %v649_v18 = vsub.f32 %v640_v51, %v1187_v6 }
 0x25c   : > { %v905_v52 = vpop.f32.mrf.mxu1 }
 0x25d   : > { %v650_v53 = vsel %vm648_vm1, %v649_v18, 0.0 }
 0x25e   : > { %v651_v54 = vmul.f32 %v650_v53, %v650_v53 }
 0x260   : > { %v652_v55 = vsel %vm245_vm0, %v651_v54, 0.0 }
 0x261   : > { %653 = vadd.xlane.f32.xlu1 %v652_v55 }
 0x262   : > { %975 = shalt.err (!%p972_p3)
}
 0x263   : > { %s976_s13 = scalar_lea.hbm %s697_s7, 16  ;;  %s980_s30 = scalar_lea.hbm %s1410_s4, 32 }
 0x264   : > { %p977_p4 = scmp.ne.s32.totalorder %s697_s7, %s976_s13  ;;  %p981_p9 = scmp.lt.s32.totalorder %s697_s7, %s1410_s4 }
 0x265   : > { %p982_p10 = scmp.lt.s32.totalorder %s980_s30, %s976_s13 }
 0x266   : > { %p978_p7 = pnand %p977_p4, %p1156_p5 }
 0x267   : > { %p983_p11 = por %p982_p10, %p981_p9 }
 0x268   : > { %p979_p8 = pneg %p978_p7 }
 0x26a   : > { %p984_p12 = pnand %p983_p11, %p979_p8 }
 0x26c   : > { %987 = shalt.err (!%p984_p12)
}
 0x26d   : > { %909 = dma.vmem_to_hbm [thread:$0]  (%p1156_p5), %s700_s26, 16, %s697_s7, %s1329_s8  }
 0x26e   : > { %s850_s9 = sshll.u32 %s1137_s22, 7  ;;  %s686_s10 = sshll.u32 %s1314_s16, 4  ;;  %s687_s10 = int_to_ptr.vmem [resolvable:$true] %s686_s10 }
 0x26f   : > { %s684_s15 = scalar_lea.hbm %s1409_s3, %s850_s9  ;;  %s665_s23 = scalar_lea.sflag [#allocation3], %s1290_s12 }
 0x270   : > { %s988_s13 = scalar_lea.vmem %s687_s10, 128  ;;  %s1084_s17 = smov [#allocation2]  }
 0x271   : > { %p989_p13 = scmp.ne.s32.totalorder %s687_s10, %s988_s13  ;;  %s992_s30 = sshll.u32 %s1084_s17, 4  ;;  %s993_s30 = int_to_ptr.vmem [resolvable:$false] %s992_s30 }
 0x272   : > { %s994_s6 = scalar_lea.vmem %s993_s30, 256  ;;  %p995_p2 = scmp.lt.s32.totalorder %s687_s10, %s993_s30 }
 0x273   : > { %p990_p0 = pnand %p989_p13, %p1156_p5  ;;  %p996_p3 = scmp.lt.s32.totalorder %s994_s6, %s988_s13 }
 0x275   : > { %p991_p1 = pneg %p990_p0  ;;  %p997_p4 = por %p996_p3, %p995_p2 }
 0x277   : > { %p998_p7 = pnand %p997_p4, %p991_p1 }
 0x279   : > { %1001 = shalt.err (!%p998_p7)
}
 0x27a   : > { %s1002_s16 = scalar_lea.hbm %s684_s15, 128  ;;  %s1006_s9 = scalar_lea.hbm %s1409_s3, 256 }
 0x27b   : > { %p1003_p8 = scmp.ne.s32.totalorder %s684_s15, %s1002_s16  ;;  %p1007_p11 = scmp.lt.s32.totalorder %s684_s15, %s1409_s3 }
 0x27c   : > { %p1008_p12 = scmp.lt.s32.totalorder %s1006_s9, %s1002_s16 }
 0x27d   : > { %p1004_p9 = pnand %p1003_p8, %p1156_p5 }
 0x27e   : > { %p1009_p13 = por %p1008_p12, %p1007_p11 }
 0x27f   : > { %p1005_p10 = pneg %p1004_p9 }
 0x281   : > { %p1010_p0 = pnand %p1009_p13, %p1005_p10 }
 0x283   : > { %1013 = shalt.err (!%p1010_p0)
}
 0x284   : > { %908 = dma.vmem_to_hbm [thread:$0]  (%p1156_p5), %s687_s10, 128, %s684_s15, %s665_s23  }
 0x285   : > { %s231_s13 = scalar_lea.vmem [#allocation6], %s1290_s12  ;;  %s710_s15 = scalar_lea.hbm %s1411_s5, %s851_s25 }
 0x286   : > { %s712_s17 = sshll.u32 %s231_s13, 4  ;;  %s1085_s12 = smov [#allocation6]   ;;  %s1363_s17 = int_to_ptr.vmem [resolvable:$true] %s712_s17 }
 0x287   : > { %s1014_s23 = scalar_lea.vmem %s1363_s17, 16  ;;  %s1018_s16 = sshll.u32 %s1085_s12, 4  ;;  %s1019_s16 = int_to_ptr.vmem [resolvable:$false] %s1018_s16 }
 0x288   : > { %p1015_p1 = scmp.ne.s32.totalorder %s1363_s17, %s1014_s23  ;;  %s1020_s26 = scalar_lea.vmem %s1019_s16, 32 }
 0x289   : > { %p1021_p4 = scmp.lt.s32.totalorder %s1363_s17, %s1019_s16  ;;  %p1022_p7 = scmp.lt.s32.totalorder %s1020_s26, %s1014_s23 }
 0x28a   : > { %p1016_p2 = pnand %p1015_p1, %p1156_p5 }
 0x28b   : > { %p1023_p8 = por %p1022_p7, %p1021_p4 }
 0x28c   : > { %p1017_p3 = pneg %p1016_p2 }
 0x28e   : > { %p1024_p9 = pnand %p1023_p8, %p1017_p3 }
 0x2ea   : > { %v654_v6 = vpop.xlane.xlu1 %653 }
 0x2eb   : > { %v655_v56 = vrot.slane %v654_v6, 4 }
 0x2ed   : > { %v656_v57 = vadd.f32 %v655_v56, %v654_v6 }
 0x2ef   : > { %v657_v58 = vrot.slane %v656_v57, 2 }
 0x2f1   : > { %v658_v59 = vadd.f32 %v657_v58, %v656_v57 }
 0x2f3   : > { %v659_v60 = vrot.slane %v658_v59, 1 }
 0x2f5   : > { %v660_v61 = vadd.f32 %v659_v60, %v658_v59 }
 0x2f7   : > { %906 = vpush %v660_v61 }
 0x328   : > { %s907_s30 = spop %906 }
 0x329   : > { %v662_v62 = vstv %s907_s30 }
 0x32a   : > { %663 = vst [vmem:[%s231_s13] sm:$0x1] %v662_v62 }
 0x32b   : > { %1027 = shalt.err (!%p1024_p9)
}
 0x32c   : > { %s1028_s22 = scalar_lea.hbm %s710_s15, 16  ;;  %s1032_s9 = scalar_lea.hbm %s1411_s5, 32 }
 0x32d   : > { %p1029_p10 = scmp.ne.s32.totalorder %s710_s15, %s1028_s22  ;;  %p1033_p13 = scmp.lt.s32.totalorder %s710_s15, %s1411_s5 }
 0x32e   : > { %p1034_p0 = scmp.lt.s32.totalorder %s1032_s9, %s1028_s22 }
 0x32f   : > { %p1030_p11 = pnand %p1029_p10, %p1156_p5 }
 0x330   : > { %p1035_p1 = por %p1034_p0, %p1033_p13 }
 0x331   : > { %p1031_p12 = pneg %p1030_p11 }
 0x333   : > { %p1036_p2 = pnand %p1035_p1, %p1031_p12 }
 0x335   : > { %1039 = shalt.err (!%p1036_p2)
}
 0x336   : > { %910 = dma.vmem_to_hbm [thread:$0]  (%p1156_p5), %s1363_s17, 16, %s710_s15, %s1329_s8  }
 0x337 PF: > { %p924_p3 = scmp.ge.s32.totalorder %s1078_s21, 2  ;;  %s724_s13 = sand.u32 1, %s1066_s18  }
 0x338   : > { %s725_s30 = scalar_lea.sflag [#allocation3], %s724_s13 }
 0x339   : > { %p915_p4 = pnand %p924_p3, %p1160_p6 }
 0x33b   : > { %p916_p7 = pneg %p915_p4 }
 0x33d   : > { %1057 = dma.done.wait (%p916_p7), %s725_s30, 128  }
 0x33e   : > { %1059 = vsyncadd (%p916_p7), %s725_s30, 4294967168  ;;  %s1415_s6 = sadd.s32 4294967294, %s1078_s21  }
 0x33f   : > { %s733_s10 = sand.u32 1, %s1415_s6  }
 0x340   : > { %s734_s23 = scalar_lea.sflag [#allocation5], %s733_s10 }
 0x341   : > { %1061 = dma.done.wait (%p916_p7), %s734_s23, 32  }
 0x342   : > { %1063 = vsyncadd (%p916_p7), %s734_s23, 4294967264  ;;  %p19_p5 = scmp.ge.s32.totalorder %s1141_s24, 4   ;;  %s1416_s18 = smov %s1070_s19 }
 0x343   : > { %s1417_s19 = smov %s1074_s20  ;;  %s1418_s20 = smov %s1154_s27 }
 0x344   : > { %s1419_s21 = smov %s1141_s24  ;;  %21 = sbr.rel (!%p19_p5) target bundleno = 5 (0x5), region = 99 }
 0x349   :  { %746 = vsyncpa [#allocation3], 1 }
 0x34a   :  { %748 = vsyncpa [#allocation3 + $0x1], 1 }
 0x34b   :  { %749 = vsyncpa [#allocation5], 1 }
 0x34c   :  { %751 = vsyncpa [#allocation5 + $0x1], 1 }

</bundles_post_ra>
